<compile_context>
chip_gen: v5e
topology: v5e:2x2
jax: 0.10.0
libtpu: 0.0.40
codegen_flags: <defaults>
</compile_context>

<pallas_src>
import jax
import jax.numpy as jnp
from jax.experimental import pallas as pl
from jax.experimental.pallas import tpu as pltpu

C = 64  # conv channel count, fixed by the module
_VMEM_LIMIT = 48 * 1024 * 1024  # safe on v5e/v6e (128 MiB) and v7x (64 MiB)


# ---------------------------------------------------------------------------
# Kernels
# ---------------------------------------------------------------------------
def _cnn_kernel(x6_ref, w1_ref, b1_ref, w2_ref, b2_ref, ms_ref, me_ref,
                o_ref, stk_ref):
    """conv1 -> relu -> pool -> conv2 -> relu -> pool for one batch tile.

    All activations live in the pooled index space m in [0, Lq): lane width is
    TB*Lq (batch elements concatenated on lanes), channels on sublanes.
      x6_ref[0]  : (6, Nq)  rows k give x[4m + k - 1] (zero padded), k=0..5
      ms_ref     : (1, Nq)  0 at per-element segment starts (m % Lq == 0)
      me_ref     : (1, Nq)  0 at per-element segment ends   (m % Lq == Lq-1)
    """
    f32 = jnp.float32
    e = x6_ref[0]                       # (6, Nq)
    w1 = w1_ref[...]                    # (C, 3)
    b1 = b1_ref[...]                    # (C, 1)

    def conv1(u, v, w):                 # in_channels == 1: broadcast VPU FMA
        return jnp.maximum(
            w1[:, 0:1] * u + w1[:, 1:2] * v + w1[:, 2:3] * w + b1, 0.0)

    o0 = conv1(e[0:1, :], e[1:2, :], e[2:3, :])   # relu(conv1) at 4m
    o1 = conv1(e[1:2, :], e[2:3, :], e[3:4, :])   # at 4m+1
    o2 = conv1(e[2:3, :], e[3:4, :], e[4:5, :])   # at 4m+2
    o3 = conv1(e[3:4, :], e[4:5, :], e[5:6, :])   # at 4m+3

    # maxpool1 (pure elementwise): p1[2m] and p1[2m+1]
    p1e = jnp.maximum(o0, o1)           # (C, Nq)
    p1o = jnp.maximum(o2, o3)           # (C, Nq)

    nq = p1e.shape[-1]
    # conv2 neighbors via XLU roll + segment-boundary masks (conv zero pad):
    #   p1[2m-1] = p1_odd[m-1],  p1[2m+2] = p1_even[m+1]
    a = pltpu.roll(p1o, shift=1, axis=1) * ms_ref[...]        # (C, Nq)
    d = pltpu.roll(p1e, shift=nq - 1, axis=1) * me_ref[...]   # (C, Nq)

    # Single fused conv2 MXU dot: (C, 3C) @ (3C, 2*Nq), columns = [even | odd].
    stk_ref[0:C, 0:nq] = a
    stk_ref[C:2 * C, 0:nq] = p1e
    stk_ref[2 * C:3 * C, 0:nq] = p1o
    stk_ref[0:C, nq:2 * nq] = p1e
    stk_ref[C:2 * C, nq:2 * nq] = p1o
    stk_ref[2 * C:3 * C, nq:2 * nq] = d

    out2 = (jnp.dot(w2_ref[...], stk_ref[...], preferred_element_type=f32)
            + b2_ref[...])                                     # (C, 2*Nq)
    out2 = jnp.maximum(out2, 0.0)

    # maxpool2 (pure elementwise)
    p2 = jnp.maximum(out2[:, 0:nq], out2[:, nq:2 * nq])        # (C, Nq)
    o_ref[...] = p2[None].astype(o_ref.dtype)


def _mlp_kernel(f_ref, wl1_ref, bl1_ref, wl2_ref, bl2_ref, o_ref):
    """lin1 -> relu -> lin2 -> relu on a batch tile (output padded to 128 lanes)."""
    f32 = jnp.float32
    y1 = jnp.maximum(
        jnp.dot(f_ref[...], wl1_ref[...], preferred_element_type=f32)
        + bl1_ref[...], 0.0)
    # TODO(synk): nn.Dropout(p) — module is built with dropout=0 so it is the
    # identity; a nonzero-p training-mode dropout would need
    # pltpu.prng_seed/prng_random_bits.
    y2 = jnp.maximum(
        jnp.dot(y1, wl2_ref[...], preferred_element_type=f32)
        + bl2_ref[...], 0.0)
    o_ref[...] = y2.astype(o_ref.dtype)


# ---------------------------------------------------------------------------
# Tiling helpers
# ---------------------------------------------------------------------------
def _pick_tb(B, Lq, max_lanes=2048):
    """Largest batch tile TB dividing B with TB*Lq <= max_lanes."""
    best = 1
    hi = max(1, min(B, max_lanes // max(Lq, 1)))
    for d in range(1, hi + 1):
        if B % d == 0:
            best = d
    return best


def _pick_mlp_tile(B, cap=512):
    """Batch tile for the MLP that satisfies the (8,128) BlockSpec rule."""
    if B <= cap:
        return B                                # block == full dim -> always OK
    for d in range(cap, 0, -1):
        if B % d == 0 and d % 8 == 0:
            return d
    return B                                    # fallback: single block


# ---------------------------------------------------------------------------
# Wrapper
# ---------------------------------------------------------------------------
def observe_embedding_cnn1d2c(x, params, input_dim, output_dim):
    """Pallas equivalent of ObserveEmbeddingCNN1D2C.forward (after .configure())."""
    w1, b1, w2, b2, wl1, bl1, wl2, bl2 = params
    f32 = jnp.float32
    L = int(input_dim)
    assert L % 4 == 0, "input_dim must be divisible by 4 (two MaxPool1d(2) stages)"
    assert x.size % L == 0, "x.size must be divisible by input_dim"
    Lq = L // 4
    B = x.size // L

    TB = _pick_tb(B, Lq)
    NT = B // TB
    Nq = TB * Lq

    # x.view(-1, 1, input_dim); six stride-4 slices e_k[b, m] = x[b, 4m + k - 1]
    # (zero padded) prepared here — cheap plain-JAX slicing on the tiny input.
    xb = x.reshape(B, L).astype(f32)
    xpad = jnp.pad(xb, ((0, 0), (1, 4)))
    es = jnp.stack([xpad[:, k:k + L:4] for k in range(6)], axis=1)   # (B, 6, Lq)
    x6 = (es.reshape(NT, TB, 6, Lq).transpose(0, 2, 1, 3)
          .reshape(NT, 6, Nq))                                       # batch concat on lanes

    # Repack torch-layout conv params.
    w1k = w1[:, 0, :].astype(f32)                                    # (C, 3)
    b1k = b1.astype(f32)[:, None]                                    # (C, 1)
    w2f = jnp.transpose(w2, (0, 2, 1)).reshape(C, 3 * C).astype(f32) # (C, 3C): [k=0|k=1|k=2]
    b2k = b2.astype(f32)[:, None]                                    # (C, 1)

    # Tiny segment-boundary masks (replace the old one-hot shift matrices).
    lane_m = jnp.arange(Nq, dtype=jnp.int32) % Lq
    ms = (lane_m != 0).astype(f32)[None, :]                          # (1, Nq)
    me = (lane_m != Lq - 1).astype(f32)[None, :]                     # (1, Nq)

    cnn_out = pl.pallas_call(
        _cnn_kernel,
        out_shape=jax.ShapeDtypeStruct((NT, C, Nq), f32),
        grid_spec=pltpu.PrefetchScalarGridSpec(
            num_scalar_prefetch=0,
            grid=(NT,),
            in_specs=[
                pl.BlockSpec((1, 6, Nq), lambda t: (t, 0, 0)),
                pl.BlockSpec((C, 3), lambda t: (0, 0)),
                pl.BlockSpec((C, 1), lambda t: (0, 0)),
                pl.BlockSpec((C, 3 * C), lambda t: (0, 0)),
                pl.BlockSpec((C, 1), lambda t: (0, 0)),
                pl.BlockSpec((1, Nq), lambda t: (0, 0)),
                pl.BlockSpec((1, Nq), lambda t: (0, 0)),
            ],
            out_specs=pl.BlockSpec((1, C, Nq), lambda t: (t, 0, 0)),
            scratch_shapes=[pltpu.VMEM((3 * C, 2 * Nq), f32)],
        ),
        compiler_params=pltpu.CompilerParams(
            dimension_semantics=("parallel",),
            vmem_limit_bytes=_VMEM_LIMIT,
        ),
    )(x6, w1k, b1k, w2f, b2k, ms, me)

    # Undo the batch-concat lane layout -> torch-order flatten (B, C*Lq).
    flat = (cnn_out.reshape(NT, C, TB, Lq).transpose(0, 2, 1, 3)
            .reshape(B, C * Lq))

    # MLP: tiled grid over batch, weights on constant index maps, output padded
    # to a 128-lane multiple so stores stay lane-dense; sliced back below.
    D = int(output_dim)
    F = C * Lq
    Dp = max(128, ((D + 127) // 128) * 128)
    wl1p = jnp.zeros((F, Dp), f32).at[:, :D].set(wl1.astype(f32))
    bl1p = jnp.zeros((1, Dp), f32).at[:, :D].set(bl1.reshape(1, D).astype(f32))
    wl2p = jnp.zeros((Dp, Dp), f32).at[:D, :D].set(wl2.astype(f32))
    bl2p = jnp.zeros((1, Dp), f32).at[:, :D].set(bl2.reshape(1, D).astype(f32))

    TBM = _pick_mlp_tile(B)
    NM = B // TBM
    out_p = pl.pallas_call(
        _mlp_kernel,
        out_shape=jax.ShapeDtypeStruct((B, Dp), f32),
        grid_spec=pltpu.PrefetchScalarGridSpec(
            num_scalar_prefetch=0,
            grid=(NM,),
            in_specs=[
                pl.BlockSpec((TBM, F), lambda i: (i, 0)),
                pl.BlockSpec((F, Dp), lambda i: (0, 0)),
                pl.BlockSpec((1, Dp), lambda i: (0, 0)),
                pl.BlockSpec((Dp, Dp), lambda i: (0, 0)),
                pl.BlockSpec((1, Dp), lambda i: (0, 0)),
            ],
            out_specs=pl.BlockSpec((TBM, Dp), lambda i: (i, 0)),
        ),
        compiler_params=pltpu.CompilerParams(
            dimension_semantics=("parallel",),
            vmem_limit_bytes=_VMEM_LIMIT,
        ),
    )(flat, wl1p, bl1p, wl2p, bl2p)
    return out_p[:, :D]


# ---------------------------------------------------------------------------
# Parameters & reference
# ---------------------------------------------------------------------------
def init_params(key, input_dim, output_dim):
    """Deterministic synthetic parameters, PyTorch-default-style uniform(-1/sqrt(fan_in))."""
    cnn_out_dim = C * (input_dim // 4)
    ks = jax.random.split(key, 8)

    def u(k, shape, fan_in):
        s = 1.0 / float(fan_in) ** 0.5
        return jax.random.uniform(k, shape, jnp.float32, -s, s)

    w1 = u(ks[0], (C, 1, 3), 3)                # torch conv1.weight layout
    b1 = u(ks[1], (C,), 3)
    w2 = u(ks[2], (C, C, 3), 3 * C)            # torch conv2.weight layout
    b2 = u(ks[3], (C,), 3 * C)
    wl1 = u(ks[4], (cnn_out_dim, output_dim), cnn_out_dim)   # lin1.weight.T
    bl1 = u(ks[5], (1, output_dim), cnn_out_dim)
    wl2 = u(ks[6], (output_dim, output_dim), output_dim)     # lin2.weight.T
    bl2 = u(ks[7], (1, output_dim), output_dim)
    return (w1, b1, w2, b2, wl1, bl1, wl2, bl2)


def ref_forward(x, params, input_dim):
    """Plain-JAX reference mirroring the PyTorch forward exactly."""
    w1, b1, w2, b2, wl1, bl1, wl2, bl2 = params
    L = input_dim
    B = x.size // L
    h = x.reshape(B, 1, L).astype(jnp.float32)

    def conv1d_pad1(h, w, b):
        Ln = h.shape[-1]
        hp = jnp.pad(h, ((0, 0), (0, 0), (1, 1)))
        out = (jnp.einsum('bil,oi->bol', hp[:, :, 0:Ln], w[:, :, 0])
               + jnp.einsum('bil,oi->bol', hp[:, :, 1:Ln + 1], w[:, :, 1])
               + jnp.einsum('bil,oi->bol', hp[:, :, 2:Ln + 2], w[:, :, 2]))
        return out + b[None, :, None]

    h = jnp.maximum(conv1d_pad1(h, w1, b1), 0.0)
    h = jnp.max(h.reshape(B, C, L // 2, 2), axis=-1)
    h = jnp.maximum(conv1d_pad1(h, w2, b2), 0.0)
    h = jnp.max(h.reshape(B, C, L // 4, 2), axis=-1)
    f = h.reshape(B, -1)
    y = jnp.maximum(f @ wl1 + bl1, 0.0)
    y = jnp.maximum(y @ wl2 + bl2, 0.0)
    return y


if __name__ == "__main__":
    key = jax.random.PRNGKey(0)
    B, H, W = 2, 16, 16                 # example observation is (16, 16) -> input_dim = 256
    D = 32                              # output_dim
    input_dim = H * W

    k_x, k_p = jax.random.split(key)
    x = jax.random.normal(k_x, (B, H, W), jnp.float32)
    params = init_params(k_p, input_dim, D)

    out = observe_embedding_cnn1d2c(x, params, input_dim, D)
    out = jax.block_until_ready(out)
    assert out.shape == (B, D), out.shape

    ref = ref_forward(x, params, input_dim)
    if not bool(jnp.allclose(out, ref, atol=1e-2, rtol=1e-2)):
        raise AssertionError("Pallas output does not match JAX reference")

    print("KERNEL_OK")
</pallas_src>

<mosaic_0001>
module attributes {stable_mosaic.version = 11 : i64} {
  func.func @_cnn_kernel(%arg0: i32, %arg1: memref<1x6x128xf32, #tpu.memory_space<vmem>>, %arg2: memref<64x3xf32, #tpu.memory_space<vmem>>, %arg3: memref<64x1xf32, #tpu.memory_space<vmem>>, %arg4: memref<64x192xf32, #tpu.memory_space<vmem>>, %arg5: memref<64x1xf32, #tpu.memory_space<vmem>>, %arg6: memref<1x128xf32, #tpu.memory_space<vmem>>, %arg7: memref<1x128xf32, #tpu.memory_space<vmem>>, %arg8: memref<1x64x128xf32, #tpu.memory_space<vmem>>, %arg9: memref<192x256xf32, #tpu.memory_space<vmem>>) attributes {dimension_semantics = [#tpu.dimension_semantics<parallel>], iteration_bounds = array<i64: 1>, scalar_prefetch = 0 : i64, scratch_operands = 1 : i64, tpu.core_type = #tpu.core_type<tc>, window_params = [{transform_indices = @transform_0, window_bounds = array<i64: 1, 6, 128>}, {pipeline_mode = #tpu.pipeline_mode<synchronous>, transform_indices = @transform_1, window_bounds = array<i64: 64, 3>}, {pipeline_mode = #tpu.pipeline_mode<synchronous>, transform_indices = @transform_2, window_bounds = array<i64: 64, 1>}, {pipeline_mode = #tpu.pipeline_mode<synchronous>, transform_indices = @transform_3, window_bounds = array<i64: 64, 192>}, {pipeline_mode = #tpu.pipeline_mode<synchronous>, transform_indices = @transform_4, window_bounds = array<i64: 64, 1>}, {pipeline_mode = #tpu.pipeline_mode<synchronous>, transform_indices = @transform_5, window_bounds = array<i64: 1, 128>}, {pipeline_mode = #tpu.pipeline_mode<synchronous>, transform_indices = @transform_6, window_bounds = array<i64: 1, 128>}, {transform_indices = @transform_7, window_bounds = array<i64: 1, 64, 128>}]} {
    %c0 = arith.constant 0 : index
    %c0_0 = arith.constant 0 : index
    %c0_1 = arith.constant 0 : index
    %0 = vector.load %arg1[%c0, %c0_0, %c0_1] : memref<1x6x128xf32, #tpu.memory_space<vmem>>, vector<1x6x128xf32>
    %1 = vector.shape_cast %0 : vector<1x6x128xf32> to vector<6x128xf32>
    %c0_2 = arith.constant 0 : index
    %c0_3 = arith.constant 0 : index
    %2 = vector.load %arg2[%c0_2, %c0_3] : memref<64x3xf32, #tpu.memory_space<vmem>>, vector<64x3xf32>
    %c0_4 = arith.constant 0 : index
    %c0_5 = arith.constant 0 : index
    %3 = vector.load %arg3[%c0_4, %c0_5] : memref<64x1xf32, #tpu.memory_space<vmem>>, vector<64x1xf32>
    %4 = vector.extract_strided_slice %1 {offsets = [0, 0], sizes = [1, 128], strides = [1, 1]} : vector<6x128xf32> to vector<1x128xf32>
    %5 = vector.extract_strided_slice %1 {offsets = [1, 0], sizes = [1, 128], strides = [1, 1]} : vector<6x128xf32> to vector<1x128xf32>
    %6 = vector.extract_strided_slice %1 {offsets = [2, 0], sizes = [1, 128], strides = [1, 1]} : vector<6x128xf32> to vector<1x128xf32>
    %7 = vector.extract_strided_slice %2 {offsets = [0, 0], sizes = [64, 1], strides = [1, 1]} : vector<64x3xf32> to vector<64x1xf32>
    %8 = vector.broadcast %7 : vector<64x1xf32> to vector<64x128xf32>
    %9 = vector.broadcast %4 : vector<1x128xf32> to vector<64x128xf32>
    %10 = arith.mulf %8, %9 : vector<64x128xf32>
    %11 = vector.extract_strided_slice %2 {offsets = [0, 1], sizes = [64, 1], strides = [1, 1]} : vector<64x3xf32> to vector<64x1xf32>
    %12 = vector.broadcast %11 : vector<64x1xf32> to vector<64x128xf32>
    %13 = vector.broadcast %5 : vector<1x128xf32> to vector<64x128xf32>
    %14 = arith.mulf %12, %13 : vector<64x128xf32>
    %15 = arith.addf %10, %14 : vector<64x128xf32>
    %16 = vector.extract_strided_slice %2 {offsets = [0, 2], sizes = [64, 1], strides = [1, 1]} : vector<64x3xf32> to vector<64x1xf32>
    %17 = vector.broadcast %16 : vector<64x1xf32> to vector<64x128xf32>
    %18 = vector.broadcast %6 : vector<1x128xf32> to vector<64x128xf32>
    %19 = arith.mulf %17, %18 : vector<64x128xf32>
    %20 = arith.addf %15, %19 : vector<64x128xf32>
    %21 = vector.broadcast %3 : vector<64x1xf32> to vector<64x128xf32>
    %22 = arith.addf %20, %21 : vector<64x128xf32>
    %cst = arith.constant 0.000000e+00 : f32
    %23 = vector.broadcast %cst : f32 to vector<64x128xf32>
    %24 = arith.maximumf %22, %23 : vector<64x128xf32>
    %25 = vector.extract_strided_slice %1 {offsets = [1, 0], sizes = [1, 128], strides = [1, 1]} : vector<6x128xf32> to vector<1x128xf32>
    %26 = vector.extract_strided_slice %1 {offsets = [2, 0], sizes = [1, 128], strides = [1, 1]} : vector<6x128xf32> to vector<1x128xf32>
    %27 = vector.extract_strided_slice %1 {offsets = [3, 0], sizes = [1, 128], strides = [1, 1]} : vector<6x128xf32> to vector<1x128xf32>
    %28 = vector.extract_strided_slice %2 {offsets = [0, 0], sizes = [64, 1], strides = [1, 1]} : vector<64x3xf32> to vector<64x1xf32>
    %29 = vector.broadcast %28 : vector<64x1xf32> to vector<64x128xf32>
    %30 = vector.broadcast %25 : vector<1x128xf32> to vector<64x128xf32>
    %31 = arith.mulf %29, %30 : vector<64x128xf32>
    %32 = vector.extract_strided_slice %2 {offsets = [0, 1], sizes = [64, 1], strides = [1, 1]} : vector<64x3xf32> to vector<64x1xf32>
    %33 = vector.broadcast %32 : vector<64x1xf32> to vector<64x128xf32>
    %34 = vector.broadcast %26 : vector<1x128xf32> to vector<64x128xf32>
    %35 = arith.mulf %33, %34 : vector<64x128xf32>
    %36 = arith.addf %31, %35 : vector<64x128xf32>
    %37 = vector.extract_strided_slice %2 {offsets = [0, 2], sizes = [64, 1], strides = [1, 1]} : vector<64x3xf32> to vector<64x1xf32>
    %38 = vector.broadcast %37 : vector<64x1xf32> to vector<64x128xf32>
    %39 = vector.broadcast %27 : vector<1x128xf32> to vector<64x128xf32>
    %40 = arith.mulf %38, %39 : vector<64x128xf32>
    %41 = arith.addf %36, %40 : vector<64x128xf32>
    %42 = vector.broadcast %3 : vector<64x1xf32> to vector<64x128xf32>
    %43 = arith.addf %41, %42 : vector<64x128xf32>
    %cst_6 = arith.constant 0.000000e+00 : f32
    %44 = vector.broadcast %cst_6 : f32 to vector<64x128xf32>
    %45 = arith.maximumf %43, %44 : vector<64x128xf32>
    %46 = vector.extract_strided_slice %1 {offsets = [2, 0], sizes = [1, 128], strides = [1, 1]} : vector<6x128xf32> to vector<1x128xf32>
    %47 = vector.extract_strided_slice %1 {offsets = [3, 0], sizes = [1, 128], strides = [1, 1]} : vector<6x128xf32> to vector<1x128xf32>
    %48 = vector.extract_strided_slice %1 {offsets = [4, 0], sizes = [1, 128], strides = [1, 1]} : vector<6x128xf32> to vector<1x128xf32>
    %49 = vector.extract_strided_slice %2 {offsets = [0, 0], sizes = [64, 1], strides = [1, 1]} : vector<64x3xf32> to vector<64x1xf32>
    %50 = vector.broadcast %49 : vector<64x1xf32> to vector<64x128xf32>
    %51 = vector.broadcast %46 : vector<1x128xf32> to vector<64x128xf32>
    %52 = arith.mulf %50, %51 : vector<64x128xf32>
    %53 = vector.extract_strided_slice %2 {offsets = [0, 1], sizes = [64, 1], strides = [1, 1]} : vector<64x3xf32> to vector<64x1xf32>
    %54 = vector.broadcast %53 : vector<64x1xf32> to vector<64x128xf32>
    %55 = vector.broadcast %47 : vector<1x128xf32> to vector<64x128xf32>
    %56 = arith.mulf %54, %55 : vector<64x128xf32>
    %57 = arith.addf %52, %56 : vector<64x128xf32>
    %58 = vector.extract_strided_slice %2 {offsets = [0, 2], sizes = [64, 1], strides = [1, 1]} : vector<64x3xf32> to vector<64x1xf32>
    %59 = vector.broadcast %58 : vector<64x1xf32> to vector<64x128xf32>
    %60 = vector.broadcast %48 : vector<1x128xf32> to vector<64x128xf32>
    %61 = arith.mulf %59, %60 : vector<64x128xf32>
    %62 = arith.addf %57, %61 : vector<64x128xf32>
    %63 = vector.broadcast %3 : vector<64x1xf32> to vector<64x128xf32>
    %64 = arith.addf %62, %63 : vector<64x128xf32>
    %cst_7 = arith.constant 0.000000e+00 : f32
    %65 = vector.broadcast %cst_7 : f32 to vector<64x128xf32>
    %66 = arith.maximumf %64, %65 : vector<64x128xf32>
    %67 = vector.extract_strided_slice %1 {offsets = [3, 0], sizes = [1, 128], strides = [1, 1]} : vector<6x128xf32> to vector<1x128xf32>
    %68 = vector.extract_strided_slice %1 {offsets = [4, 0], sizes = [1, 128], strides = [1, 1]} : vector<6x128xf32> to vector<1x128xf32>
    %69 = vector.extract_strided_slice %1 {offsets = [5, 0], sizes = [1, 128], strides = [1, 1]} : vector<6x128xf32> to vector<1x128xf32>
    %70 = vector.extract_strided_slice %2 {offsets = [0, 0], sizes = [64, 1], strides = [1, 1]} : vector<64x3xf32> to vector<64x1xf32>
    %71 = vector.broadcast %70 : vector<64x1xf32> to vector<64x128xf32>
    %72 = vector.broadcast %67 : vector<1x128xf32> to vector<64x128xf32>
    %73 = arith.mulf %71, %72 : vector<64x128xf32>
    %74 = vector.extract_strided_slice %2 {offsets = [0, 1], sizes = [64, 1], strides = [1, 1]} : vector<64x3xf32> to vector<64x1xf32>
    %75 = vector.broadcast %74 : vector<64x1xf32> to vector<64x128xf32>
    %76 = vector.broadcast %68 : vector<1x128xf32> to vector<64x128xf32>
    %77 = arith.mulf %75, %76 : vector<64x128xf32>
    %78 = arith.addf %73, %77 : vector<64x128xf32>
    %79 = vector.extract_strided_slice %2 {offsets = [0, 2], sizes = [64, 1], strides = [1, 1]} : vector<64x3xf32> to vector<64x1xf32>
    %80 = vector.broadcast %79 : vector<64x1xf32> to vector<64x128xf32>
    %81 = vector.broadcast %69 : vector<1x128xf32> to vector<64x128xf32>
    %82 = arith.mulf %80, %81 : vector<64x128xf32>
    %83 = arith.addf %78, %82 : vector<64x128xf32>
    %84 = vector.broadcast %3 : vector<64x1xf32> to vector<64x128xf32>
    %85 = arith.addf %83, %84 : vector<64x128xf32>
    %cst_8 = arith.constant 0.000000e+00 : f32
    %86 = vector.broadcast %cst_8 : f32 to vector<64x128xf32>
    %87 = arith.maximumf %85, %86 : vector<64x128xf32>
    %88 = arith.maximumf %24, %45 : vector<64x128xf32>
    %89 = arith.maximumf %66, %87 : vector<64x128xf32>
    %c1_i32 = arith.constant 1 : i32
    %90 = tpu.dynamic_rotate %89 by %c1_i32 dim 1 : vector<64x128xf32>, i32 -> vector<64x128xf32>
    %c0_9 = arith.constant 0 : index
    %c0_10 = arith.constant 0 : index
    %91 = vector.load %arg6[%c0_9, %c0_10] : memref<1x128xf32, #tpu.memory_space<vmem>>, vector<1x128xf32>
    %92 = vector.broadcast %91 : vector<1x128xf32> to vector<64x128xf32>
    %93 = arith.mulf %90, %92 : vector<64x128xf32>
    %c127_i32 = arith.constant 127 : i32
    %94 = tpu.dynamic_rotate %88 by %c127_i32 dim 1 : vector<64x128xf32>, i32 -> vector<64x128xf32>
    %c0_11 = arith.constant 0 : index
    %c0_12 = arith.constant 0 : index
    %95 = vector.load %arg7[%c0_11, %c0_12] : memref<1x128xf32, #tpu.memory_space<vmem>>, vector<1x128xf32>
    %96 = vector.broadcast %95 : vector<1x128xf32> to vector<64x128xf32>
    %97 = arith.mulf %94, %96 : vector<64x128xf32>
    %c0_13 = arith.constant 0 : index
    %c0_14 = arith.constant 0 : index
    %98 = vector.load %arg9[%c0_13, %c0_14] : memref<192x256xf32, #tpu.memory_space<vmem>>, vector<64x128xf32>
    tpu.vector_store %arg9[%c0_13, %c0_14], %93 {strides = array<i32>} : memref<192x256xf32, #tpu.memory_space<vmem>>, vector<64x128xf32>,
    %c64 = arith.constant 64 : index
    %c0_15 = arith.constant 0 : index
    %99 = vector.load %arg9[%c64, %c0_15] : memref<192x256xf32, #tpu.memory_space<vmem>>, vector<64x128xf32>
    tpu.vector_store %arg9[%c64, %c0_15], %88 {strides = array<i32>} : memref<192x256xf32, #tpu.memory_space<vmem>>, vector<64x128xf32>,
    %c128 = arith.constant 128 : index
    %c0_16 = arith.constant 0 : index
    %100 = vector.load %arg9[%c128, %c0_16] : memref<192x256xf32, #tpu.memory_space<vmem>>, vector<64x128xf32>
    tpu.vector_store %arg9[%c128, %c0_16], %89 {strides = array<i32>} : memref<192x256xf32, #tpu.memory_space<vmem>>, vector<64x128xf32>,
    %c0_17 = arith.constant 0 : index
    %c128_18 = arith.constant 128 : index
    %101 = vector.load %arg9[%c0_17, %c128_18] : memref<192x256xf32, #tpu.memory_space<vmem>>, vector<64x128xf32>
    tpu.vector_store %arg9[%c0_17, %c128_18], %88 {strides = array<i32>} : memref<192x256xf32, #tpu.memory_space<vmem>>, vector<64x128xf32>,
    %c64_19 = arith.constant 64 : index
    %c128_20 = arith.constant 128 : index
    %102 = vector.load %arg9[%c64_19, %c128_20] : memref<192x256xf32, #tpu.memory_space<vmem>>, vector<64x128xf32>
    tpu.vector_store %arg9[%c64_19, %c128_20], %89 {strides = array<i32>} : memref<192x256xf32, #tpu.memory_space<vmem>>, vector<64x128xf32>,
    %c128_21 = arith.constant 128 : index
    %c128_22 = arith.constant 128 : index
    %103 = vector.load %arg9[%c128_21, %c128_22] : memref<192x256xf32, #tpu.memory_space<vmem>>, vector<64x128xf32>
    tpu.vector_store %arg9[%c128_21, %c128_22], %97 {strides = array<i32>} : memref<192x256xf32, #tpu.memory_space<vmem>>, vector<64x128xf32>,
    %c0_23 = arith.constant 0 : index
    %c0_24 = arith.constant 0 : index
    %104 = vector.load %arg4[%c0_23, %c0_24] : memref<64x192xf32, #tpu.memory_space<vmem>>, vector<64x192xf32>
    %c0_25 = arith.constant 0 : index
    %c0_26 = arith.constant 0 : index
    %105 = vector.load %arg9[%c0_25, %c0_26] : memref<192x256xf32, #tpu.memory_space<vmem>>, vector<192x256xf32>
    %cst_27 = arith.constant dense<0.000000e+00> : vector<64x256xf32>
    %106 = tpu.matmul %104, %105, %cst_27 {dimension_numbers = #tpu.dot_dimension_numbers<[1], [0], [0], [1], [0, 0, 1, 1], [], []>} : vector<64x192xf32>, vector<192x256xf32>, vector<64x256xf32> -> vector<64x256xf32>
    %c0_28 = arith.constant 0 : index
    %c0_29 = arith.constant 0 : index
    %107 = vector.load %arg5[%c0_28, %c0_29] : memref<64x1xf32, #tpu.memory_space<vmem>>, vector<64x1xf32>
    %108 = vector.broadcast %107 : vector<64x1xf32> to vector<64x256xf32>
    %109 = arith.addf %106, %108 : vector<64x256xf32>
    %cst_30 = arith.constant 0.000000e+00 : f32
    %110 = vector.broadcast %cst_30 : f32 to vector<64x256xf32>
    %111 = arith.maximumf %109, %110 : vector<64x256xf32>
    %112 = vector.extract_strided_slice %111 {offsets = [0, 0], sizes = [64, 128], strides = [1, 1]} : vector<64x256xf32> to vector<64x128xf32>
    %113 = vector.extract_strided_slice %111 {offsets = [0, 128], sizes = [64, 128], strides = [1, 1]} : vector<64x256xf32> to vector<64x128xf32>
    %114 = arith.maximumf %112, %113 : vector<64x128xf32>
    %115 = vector.shape_cast %114 : vector<64x128xf32> to vector<1x64x128xf32>
    %c0_31 = arith.constant 0 : index
    %c0_32 = arith.constant 0 : index
    %c0_33 = arith.constant 0 : index
    %116 = vector.load %arg8[%c0_31, %c0_32, %c0_33] : memref<1x64x128xf32, #tpu.memory_space<vmem>>, vector<1x64x128xf32>
    tpu.vector_store %arg8[%c0_31, %c0_32, %c0_33], %115 {strides = array<i32>} : memref<1x64x128xf32, #tpu.memory_space<vmem>>, vector<1x64x128xf32>,
    return
  }
  func.func @transform_0(%arg0: i32) -> (i32, i32, i32) {
    %c0_i32 = arith.constant 0 : i32
    %c0_i32_0 = arith.constant 0 : i32
    %c0_i32_1 = arith.constant 0 : i32
    return %arg0, %c0_i32, %c0_i32_0 : i32, i32, i32
  }
  func.func @transform_1(%arg0: i32) -> (i32, i32) {
    %c0_i32 = arith.constant 0 : i32
    %c0_i32_0 = arith.constant 0 : i32
    %c0_i32_1 = arith.constant 0 : i32
    return %c0_i32, %c0_i32_0 : i32, i32
  }
  func.func @transform_2(%arg0: i32) -> (i32, i32) {
    %c0_i32 = arith.constant 0 : i32
    %c0_i32_0 = arith.constant 0 : i32
    %c0_i32_1 = arith.constant 0 : i32
    return %c0_i32, %c0_i32_0 : i32, i32
  }
  func.func @transform_3(%arg0: i32) -> (i32, i32) {
    %c0_i32 = arith.constant 0 : i32
    %c0_i32_0 = arith.constant 0 : i32
    %c0_i32_1 = arith.constant 0 : i32
    return %c0_i32, %c0_i32_0 : i32, i32
  }
  func.func @transform_4(%arg0: i32) -> (i32, i32) {
    %c0_i32 = arith.constant 0 : i32
    %c0_i32_0 = arith.constant 0 : i32
    %c0_i32_1 = arith.constant 0 : i32
    return %c0_i32, %c0_i32_0 : i32, i32
  }
  func.func @transform_5(%arg0: i32) -> (i32, i32) {
    %c0_i32 = arith.constant 0 : i32
    %c0_i32_0 = arith.constant 0 : i32
    %c0_i32_1 = arith.constant 0 : i32
    return %c0_i32, %c0_i32_0 : i32, i32
  }
  func.func @transform_6(%arg0: i32) -> (i32, i32) {
    %c0_i32 = arith.constant 0 : i32
    %c0_i32_0 = arith.constant 0 : i32
    %c0_i32_1 = arith.constant 0 : i32
    return %c0_i32, %c0_i32_0 : i32, i32
  }
  func.func @transform_7(%arg0: i32) -> (i32, i32, i32) {
    %c0_i32 = arith.constant 0 : i32
    %c0_i32_0 = arith.constant 0 : i32
    %c0_i32_1 = arith.constant 0 : i32
    return %arg0, %c0_i32, %c0_i32_0 : i32, i32, i32
  }
}

</mosaic_0001>

<bundles_post_ra>
// kernel: tpu_custom_call.1
= control target key start
LH: loop header
LB: loop body
LE: loop exit
PB: predicated region body
PF: predicated region fallthrough
CT: control target
= control target key end

     0   :  { %v963_v2 = vmov 2   ;;  %v964_v3 = vmov 1   ;;  %v965_v4 = vmov 0   ;;  %s1423_s0 = inlined_call_operand.vmem [shape: f32[1,6,128], index: 0, kind: input, shape index: {}]   ;;  %s1424_s1 = inlined_call_operand.vmem [shape: f32[64,3], index: 1, kind: input, shape index: {}]   ;;  %s1425_s2 = inlined_call_operand.vmem [shape: f32[64,1], index: 2, kind: input, shape index: {}]   ;;  %s1426_s3 = inlined_call_operand.vmem [shape: f32[64,192], index: 3, kind: input, shape index: {}]   ;;  %s1427_s4 = inlined_call_operand.vmem [shape: f32[64,1], index: 4, kind: input, shape index: {}]   ;;  %s1428_s5 = inlined_call_operand.vmem [shape: f32[1,128], index: 5, kind: input, shape index: {}]   ;;  %s1429_s6 = inlined_call_operand.vmem [shape: f32[1,128], index: 6, kind: input, shape index: {}]   ;;  %s1430_s7 = inlined_call_operand.hbm [shape: f32[1,64,128], index: 7, kind: output, shape index: {}]  }
   0x1   :  { %v35_v0 = vld [vmem:[%s1424_s1 + $0x38] sm:$0xff]  ;;  %v34_v1 = vld [vmem:[%s1424_s1 + $0x30] sm:$0xff]  ;;  %916 = vset.pattern.permute.xlu2 %v963_v2  ;;  %913 = vset.pattern.permute.xlu0 %v964_v3 }
   0x2   :  { %914 = vset.pattern.permute.xlu1 %v965_v4  ;;  %171 = vperm.xlu2 %916, %v35_v0  }
   0x3   :  { %12 = vsyncpa [#allocation4], 0  ;;  %122 = vperm.xlu0 %913, %v35_v0   ;;  %76 = vperm.xlu1 %914, %v34_v1   ;;  %v31_v5 = vld [vmem:[%s1424_s1 + $0x18] sm:$0xff]  ;;  %v33_v6 = vld [vmem:[%s1424_s1 + $0x28] sm:$0xff]  ;;  %vm650_vm0 = vcmask 523264   ;;  %s969_s11 = smov 128  }
   0x4   :  { %v32_v7 = vld [vmem:[%s1424_s1 + $0x20] sm:$0xff]  ;;  %v43_v9 = vld [vmem:[%s1425_s2 + $0x38] sm:$0xff]  ;;  %v42_v10 = vld [vmem:[%s1425_s2 + $0x30] sm:$0xff] }
   0x5   :  { %v40_v8 = vld [vmem:[%s1425_s2 + $0x20] sm:$0xff]  ;;  %v30_v11 = vld [vmem:[%s1424_s1 + $0x10] sm:$0xff]  ;;  %v41_v13 = vld [vmem:[%s1425_s2 + $0x28] sm:$0xff] }
   0x6   :  { %v28_v12 = vld [vmem:[%s1424_s1] sm:$0xff]  ;;  %v29_v14 = vld [vmem:[%s1424_s1 + $0x8] sm:$0xff]  ;;  %v39_v15 = vld [vmem:[%s1425_s2 + $0x18] sm:$0xff] }
   0x7   :  { %v38_v17 = vld [vmem:[%s1425_s2 + $0x10] sm:$0xff]  ;;  %v37_v18 = vld [vmem:[%s1425_s2 + $0x8] sm:$0xff]  ;;  %v36_v20 = vld [vmem:[%s1425_s2] sm:$0xff]  ;;  %s967_s2 = smov 1  }
   0x8   :  { %v27_v25 = vld [vmem:[%s1423_s0] sm:$0x3f]  ;;  %s966_s0 = smov 127  }
   0x9   :  { %v1079_v27 = vperm.slane %v27_v25, 1  ;;  %v1081_v28 = vperm.slane %v27_v25, 2  ;;  %v1083_v29 = vperm.slane %v27_v25, 0  ;;  %v1091_v34 = vperm.slane %v27_v25, 3 }
   0xa   :  { %917 = vset.pattern.permute.xlu2 %v965_v4  ;;  %v1095_v37 = vperm.slane %v27_v25, 4  ;;  %v1103_v45 = vperm.slane %v27_v25, 5 }
   0xb   :  { %915 = vset.pattern.permute.xlu1 %v964_v3  ;;  %106 = vperm.xlu0 %913, %v31_v5  }
   0xc   :  { %118 = vperm.xlu1 %915, %v34_v1   ;;  %71 = vperm.xlu2 %917, %v33_v6  }
  0x13   :  { %921 = vset.pattern.permute.xlu0 %v965_v4 }
  0x14   :  { %114 = vperm.xlu1 %915, %v33_v6   ;;  %918 = vset.pattern.permute.xlu2 %v963_v2 }
  0x15   :  { %81 = vperm.xlu0 %921, %v35_v0   ;;  %167 = vperm.xlu2 %918, %v34_v1  }
  0x1c   :  { %110 = vperm.xlu1 %915, %v32_v7  }
  0x1d   :  { %66 = vperm.xlu0 %921, %v32_v7   ;;  %163 = vperm.xlu2 %918, %v33_v6  }
  0x24   :  { %919 = vset.pattern.permute.xlu1 %v965_v4 }
  0x25   :  { %213 = vperm.xlu0 %921, %v40_v8   ;;  %920 = vset.pattern.permute.xlu2 %v965_v4 }
  0x26   :  { %228 = vperm.xlu1 %919, %v43_v9   ;;  %61 = vperm.xlu2 %920, %v31_v5  }
  0x2d   :  { %928 = vset.pattern.permute.xlu0 %v963_v2 }
  0x2e   :  { %922 = vset.pattern.permute.xlu1 %v963_v2  ;;  %155 = vperm.xlu0 %928, %v31_v5  }
  0x2f   :  { %159 = vperm.xlu1 %922, %v32_v7   ;;  %223 = vperm.xlu2 %920, %v42_v10  }
  0x36   :  { %143 = vperm.xlu0 %928, %v28_v12  }
  0x37   :  { %923 = vset.pattern.permute.xlu1 %v965_v4  ;;  %924 = vset.pattern.permute.xlu2 %v964_v3 }
  0x38   :  { %102 = vperm.xlu2 %924, %v30_v11   ;;  %56 = vperm.xlu1 %923, %v30_v11  }
  0x3e   :  { %934 = vset.pattern.permute.xlu0 %v965_v4 }
  0x40   :  { %925 = vset.pattern.permute.xlu2 %v965_v4  ;;  %218 = vperm.xlu1 %923, %v41_v13  }
  0x41   :  { %51 = vperm.xlu2 %925, %v29_v14  }
  0x48   :  { %926 = vset.pattern.permute.xlu1 %v964_v3 }
  0x49   :  { %98 = vperm.xlu1 %926, %v29_v14   ;;  %927 = vset.pattern.permute.xlu2 %v963_v2 }
  0x4a   :  { %151 = vperm.xlu2 %927, %v30_v11  }
  0x51   :  { %929 = vset.pattern.permute.xlu1 %v965_v4 }
  0x52   :  { %930 = vset.pattern.permute.xlu2 %v964_v3  ;;  %46 = vperm.xlu1 %929, %v28_v12  }
  0x53   :  { %94 = vperm.xlu2 %930, %v28_v12  }
  0x5a   :  { %931 = vset.pattern.permute.xlu1 %v963_v2 }
  0x5b   :  { %932 = vset.pattern.permute.xlu2 %v965_v4  ;;  %147 = vperm.xlu1 %931, %v29_v14  }
  0x5c   :  { %208 = vperm.xlu2 %932, %v39_v15   ;;  %v1060_v16 = vpop.permute.xlu2 %171 }
  0x63   :  { %933 = vset.pattern.permute.xlu1 %v965_v4 }
  0x64   :  { %203 = vperm.xlu1 %933, %v38_v17   ;;  %198 = vperm.xlu2 %932, %v37_v18   ;;  %v182_v18 = vmul.f32 %v1081_v28, %v1060_v16 }
  0x66   :  { %v1069_v19 = vpop.permute.xlu2 %71 }
  0x6c   :  { %193 = vperm.xlu1 %933, %v36_v20   ;;  %v279_v20 = vmul.f32 %v1091_v34, %v1060_v16 }
  0x6f   :  { %v168_v21 = vpop.permute.xlu2 %167 }
  0x70   :  { %v181_v38 = vmul.f32 %v1081_v28, %v168_v21  ;;  %v278_v39 = vmul.f32 %v1091_v34, %v168_v21  ;;  %v335_v51 = vmul.f32 %v1095_v37, %v168_v21  ;;  %v392_v52 = vmul.f32 %v1103_v45, %v168_v21 }
  0x71   :  { %v336_v21 = vmul.f32 %v1095_v37, %v1060_v16 }
  0x75   :  { %v77_v22 = vpop.permute.xlu1 %76  ;;  %v123_v24 = vpop.permute.xlu0 %122 }
  0x76   :  { %v91_v35 = vmul.f32 %v1083_v29, %v77_v22  ;;  %v253_v36 = vmul.f32 %v1079_v27, %v77_v22  ;;  %v310_v46 = vmul.f32 %v1081_v28, %v77_v22  ;;  %v367_v47 = vmul.f32 %v1091_v34, %v77_v22 }
  0x77   :  { %v1074_v23 = vpop.permute.xlu2 %163  ;;  %v133_v58 = vmul.f32 %v1079_v27, %v123_v24  ;;  %v262_v59 = vmul.f32 %v1081_v28, %v123_v24  ;;  %v319_v62 = vmul.f32 %v1091_v34, %v123_v24  ;;  %v376_v63 = vmul.f32 %v1095_v37, %v123_v24 }
  0x78   :  { %v393_v22 = vmul.f32 %v1103_v45, %v1060_v16 }
  0x7d   :  { %v1089_v33 = vpop.permute.xlu0 %106 }
  0x7e   :  { %v119_v26 = vpop.permute.xlu1 %118 }
  0x7f   :  { %v132_v31 = vmul.f32 %v1079_v27, %v119_v26  ;;  %v261_v32 = vmul.f32 %v1081_v28, %v119_v26  ;;  %v318_v42 = vmul.f32 %v1091_v34, %v119_v26  ;;  %v375_v43 = vmul.f32 %v1095_v37, %v119_v26 }
  0x80   :  { %v1085_v30 = vpop.permute.xlu2 %61 }
  0x81   :  { %v140_v40 = vadd.f32 %v132_v31, %v91_v35  ;;  %v269_v41 = vadd.f32 %v261_v32, %v253_v36  ;;  %v326_v53 = vadd.f32 %v318_v42, %v310_v46  ;;  %v383_v54 = vadd.f32 %v375_v43, %v367_v47 }
  0x83   :  { %v189_v49 = vadd.f32 %v181_v38, %v140_v40  ;;  %v286_v50 = vadd.f32 %v278_v39, %v269_v41  ;;  %v343_v0 = vadd.f32 %v335_v51, %v326_v53  ;;  %v400_v1 = vadd.f32 %v392_v52, %v383_v54 }
  0x86   :  { %v1101_v44 = vpop.permute.xlu1 %114 }
  0x87   :  { %v82_v57 = vpop.permute.xlu0 %81 }
  0x88   :  { %v92_v3 = vmul.f32 %v1083_v29, %v82_v57  ;;  %v254_v4 = vmul.f32 %v1079_v27, %v82_v57  ;;  %v311_v5 = vmul.f32 %v1081_v28, %v82_v57  ;;  %v368_v6 = vmul.f32 %v1091_v34, %v82_v57 }
  0x89   :  { %v224_v48 = vpop.permute.xlu2 %223 }
  0x8a   :  { %v237_v55 = vadd.f32 %v224_v48, %v189_v49  ;;  %v294_v56 = vadd.f32 %v286_v50, %v224_v48  ;;  %v351_v7 = vadd.f32 %v343_v0, %v224_v48  ;;  %v408_v8 = vadd.f32 %v400_v1, %v224_v48 }
  0x8b   :  { %v141_v11 = vadd.f32 %v133_v58, %v92_v3  ;;  %v270_v12 = vadd.f32 %v262_v59, %v254_v4  ;;  %v327_v13 = vadd.f32 %v319_v62, %v311_v5  ;;  %v384_v14 = vadd.f32 %v376_v63, %v368_v6 }
  0x8c   :  { %v245_v60 = vmax.f32 %v237_v55, 0.0  ;;  %v302_v61 = vmax.f32 %v294_v56, 0.0  ;;  %v359_v15 = vmax.f32 %v351_v7, 0.0  ;;  %v416_v17 = vmax.f32 %v408_v8, 0.0 }
  0x8d   :  { %v190_v24 = vadd.f32 %v182_v18, %v141_v11  ;;  %v287_v25 = vadd.f32 %v279_v20, %v270_v12  ;;  %v344_v26 = vadd.f32 %v336_v21, %v327_v13  ;;  %v401_v31 = vadd.f32 %v393_v22, %v384_v14 }
  0x8e   :  { %v111_v2 = vpop.permute.xlu1 %110  ;;  %v1117_v9 = vmax.f32 %v245_v60, %v302_v61  ;;  %v432_v35 = vmax.f32 %v359_v15, %v416_v17  ;;  %v90_v13 = vmul.f32 %v1083_v29, %v1069_v19  ;;  %v252_v14 = vmul.f32 %v1079_v27, %v1069_v19 }
  0x8f   :  { %v67_v36 = vpop.permute.xlu0 %66  ;;  %v130_v48 = vmul.f32 %v1079_v27, %v111_v2  ;;  %v259_v49 = vmul.f32 %v1081_v28, %v111_v2  ;;  %v316_v54 = vmul.f32 %v1091_v34, %v111_v2  ;;  %v373_v55 = vmul.f32 %v1095_v37, %v111_v2 }
  0x90   :  { %474 = vrot.lane.b32.xlu0 %v1117_v9, %s966_s0  ;;  %v89_v50 = vmul.f32 %v1083_v29, %v67_v36  ;;  %v251_v51 = vmul.f32 %v1079_v27, %v67_v36  ;;  %v308_v56 = vmul.f32 %v1081_v28, %v67_v36  ;;  %v365_v57 = vmul.f32 %v1091_v34, %v67_v36 }
  0x91   :  { %v309_v15 = vmul.f32 %v1081_v28, %v1069_v19  ;;  %v366_v17 = vmul.f32 %v1091_v34, %v1069_v19  ;;  %v180_v18 = vmul.f32 %v1081_v28, %v1074_v23  ;;  %v131_v22 = vmul.f32 %v1079_v27, %v1101_v44 }
  0x92   :  { %v1119_v10 = vpop.permute.xlu2 %102  ;;  %v138_v58 = vadd.f32 %v130_v48, %v89_v50  ;;  %v267_v59 = vadd.f32 %v259_v49, %v251_v51  ;;  %v324_v2 = vadd.f32 %v316_v54, %v308_v56  ;;  %v381_v3 = vadd.f32 %v373_v55, %v365_v57 }
  0x93   :  { %v277_v19 = vmul.f32 %v1091_v34, %v1074_v23  ;;  %v364_v54 = vmul.f32 %v1091_v34, %v1085_v30 }
  0x97   :  { %v214_v1 = vpop.permute.xlu0 %213 }
  0x98   :  { %v229_v32 = vpop.permute.xlu1 %228  ;;  %446 = vrot.lane.b32.xlu0 %v432_v35, %s967_s2 }
  0x99   :  { %v238_v38 = vadd.f32 %v229_v32, %v190_v24  ;;  %v295_v39 = vadd.f32 %v287_v25, %v229_v32  ;;  %v352_v40 = vadd.f32 %v344_v26, %v229_v32  ;;  %v409_v41 = vadd.f32 %v401_v31, %v229_v32 }
  0x9a   :  { %v260_v24 = vmul.f32 %v1081_v28, %v1101_v44  ;;  %v317_v25 = vmul.f32 %v1091_v34, %v1101_v44  ;;  %v374_v26 = vmul.f32 %v1095_v37, %v1101_v44  ;;  %v88_v44 = vmul.f32 %v1083_v29, %v1085_v30 }
  0x9b   :  { %v1132_v42 = vpop.permute.xlu2 %51  ;;  %v360_v43 = vmax.f32 %v352_v40, 0.0  ;;  %v417_v46 = vmax.f32 %v409_v41, 0.0  ;;  %v246_v47 = vmax.f32 %v238_v38, 0.0  ;;  %v303_v16 = vmax.f32 %v295_v39, 0.0 }
  0x9c   :  { %v334_v38 = vmul.f32 %v1095_v37, %v1074_v23  ;;  %v391_v39 = vmul.f32 %v1103_v45, %v1074_v23  ;;  %v129_v40 = vmul.f32 %v1079_v27, %v1089_v33  ;;  %v258_v41 = vmul.f32 %v1081_v28, %v1089_v33 }
  0x9d   :  { %v433_v52 = vmax.f32 %v360_v43, %v417_v46  ;;  %v1138_v53 = vmax.f32 %v246_v47, %v303_v16  ;;  %v315_v43 = vmul.f32 %v1091_v34, %v1089_v33  ;;  %v372_v46 = vmul.f32 %v1095_v37, %v1089_v33 }
  0x9e   :  { %v250_v47 = vmul.f32 %v1079_v27, %v1085_v30  ;;  %v139_v23 = vadd.f32 %v131_v22, %v90_v13  ;;  %v268_v16 = vadd.f32 %v260_v24, %v252_v14  ;;  %v325_v48 = vadd.f32 %v317_v25, %v309_v15 }
  0x9f   :  { %448 = vrot.lane.b32.xlu1 %v433_v52, %s967_s2  ;;  %724 = vmatpush.msra.mxu1 %v433_v52  ;;  %v382_v49 = vadd.f32 %v374_v26, %v366_v17  ;;  %v137_v56 = vadd.f32 %v129_v40, %v88_v44 }
  0xa0   :  { %757 = vmatpush.msra.mxu2 %v433_v52  ;;  %476 = vrot.lane.b32.xlu2 %v1138_v53, %s966_s0  ;;  %v156_v50 = vpop.permute.xlu0 %155  ;;  %v307_v52 = vmul.f32 %v1081_v28, %v1085_v30 }
  0xa1   :  { %675 = vmatpush.msra.mxu0 %v1138_v53  ;;  %v160_v60 = vpop.permute.xlu1 %159  ;;  %725 = vmatpush.msra.mxu1 %v432_v35  ;;  %v178_v57 = vmul.f32 %v1081_v28, %v156_v50 }
  0xa2   :  { %v179_v61 = vmul.f32 %v1081_v28, %v160_v60  ;;  %v276_v62 = vmul.f32 %v1091_v34, %v160_v60  ;;  %v333_v63 = vmul.f32 %v1095_v37, %v160_v60  ;;  %v390_v0 = vmul.f32 %v1103_v45, %v160_v60  ;;  %758 = vmatpush.msra.mxu2 %v432_v35 }
  0xa3   :  { %676 = vmatpush.msra.mxu0 %v1117_v9  ;;  %v389_v60 = vmul.f32 %v1103_v45, %v156_v50 }
  0xa4   :  { %v187_v4 = vadd.f32 %v179_v61, %v138_v58  ;;  %v284_v5 = vadd.f32 %v276_v62, %v267_v59  ;;  %v1153_v6 = vpop.permute.xlu2 %151  ;;  %v341_v7 = vadd.f32 %v333_v63, %v324_v2  ;;  %v398_v8 = vadd.f32 %v390_v0, %v381_v3 }
  0xa5   :  { %v275_v58 = vmul.f32 %v1091_v34, %v156_v50  ;;  %v332_v59 = vmul.f32 %v1095_v37, %v156_v50  ;;  %v188_v61 = vadd.f32 %v180_v18, %v139_v23  ;;  %v285_v62 = vadd.f32 %v277_v19, %v268_v16 }
  0xa6   :  { %v235_v11 = vadd.f32 %v214_v1, %v187_v4  ;;  %v292_v12 = vadd.f32 %v284_v5, %v214_v1  ;;  %v349_v35 = vadd.f32 %v341_v7, %v214_v1  ;;  %v406_v36 = vadd.f32 %v398_v8, %v214_v1 }
  0xa7   :  { %v342_v63 = vadd.f32 %v334_v38, %v325_v48  ;;  %v399_v0 = vadd.f32 %v391_v39, %v382_v49  ;;  %v266_v1 = vadd.f32 %v258_v41, %v250_v47  ;;  %v323_v2 = vadd.f32 %v315_v43, %v307_v52 }
  0xa8   :  { %v243_v20 = vmax.f32 %v235_v11, 0.0  ;;  %v300_v21 = vmax.f32 %v292_v12, 0.0  ;;  %v357_v33 = vmax.f32 %v349_v35, 0.0  ;;  %v414_v55 = vmax.f32 %v406_v36, 0.0 }
  0xa9   :  { %v380_v3 = vadd.f32 %v372_v46, %v364_v54  ;;  %v186_v12 = vadd.f32 %v178_v57, %v137_v56  ;;  %v283_v13 = vadd.f32 %v275_v58, %v266_v1  ;;  %v340_v14 = vadd.f32 %v332_v59, %v323_v2  ;;  %v144_v56 = vpop.permute.xlu0 %143 }
  0xaa   :  { %v1175_v31 = vpop.permute.xlu1 %56  ;;  %v1177_v32 = vmax.f32 %v243_v20, %v300_v21  ;;  %v430_v30 = vmax.f32 %v357_v33, %v414_v55  ;;  %v128_v23 = vmul.f32 %v1079_v27, %v1119_v10  ;;  %v257_v16 = vmul.f32 %v1081_v28, %v1119_v10 }
  0xab   :  { %v397_v15 = vadd.f32 %v389_v60, %v380_v3  ;;  %v314_v48 = vmul.f32 %v1091_v34, %v1119_v10  ;;  %v371_v49 = vmul.f32 %v1095_v37, %v1119_v10  ;;  %v86_v50 = vmul.f32 %v1083_v29, %v1132_v42 }
  0xac   :  { %470 = vrot.lane.b32.xlu1 %v1177_v32, %s966_s0  ;;  %v248_v57 = vmul.f32 %v1079_v27, %v1132_v42  ;;  %v305_v58 = vmul.f32 %v1081_v28, %v1132_v42  ;;  %v362_v10 = vmul.f32 %v1091_v34, %v1132_v42  ;;  %v177_v59 = vmul.f32 %v1081_v28, %v1153_v6 }
  0xad   :  { %v1197_v51 = vpop.permute.xlu2 %94  ;;  %v274_v60 = vmul.f32 %v1091_v34, %v1153_v6  ;;  %v306_v42 = vmul.f32 %v1081_v28, %v1175_v31  ;;  %v363_v1 = vmul.f32 %v1091_v34, %v1175_v31  ;;  %v175_v2 = vmul.f32 %v1081_v28, %v144_v56 }
  0xb2   :  { %v219_v4 = vpop.permute.xlu1 %218 }
  0xb3   :  { %v236_v5 = vadd.f32 %v219_v4, %v188_v61  ;;  %v293_v7 = vadd.f32 %v285_v62, %v219_v4  ;;  %v350_v8 = vadd.f32 %v342_v63, %v219_v4  ;;  %v407_v11 = vadd.f32 %v399_v0, %v219_v4 }
  0xb4   :  { %442 = vrot.lane.b32.xlu1 %v430_v30, %s967_s2  ;;  %v331_v61 = vmul.f32 %v1095_v37, %v1153_v6  ;;  %v87_v62 = vmul.f32 %v1083_v29, %v1175_v31  ;;  %v249_v63 = vmul.f32 %v1079_v27, %v1175_v31  ;;  %v388_v0 = vmul.f32 %v1103_v45, %v1153_v6 }
  0xb5   :  { %v358_v17 = vmax.f32 %v350_v8, 0.0  ;;  %v415_v18 = vmax.f32 %v407_v11, 0.0  ;;  %v244_v20 = vmax.f32 %v236_v5, 0.0  ;;  %v301_v21 = vmax.f32 %v293_v7, 0.0 }
  0xb6   :  { %v209_v22 = vpop.permute.xlu2 %208  ;;  %v329_v31 = vmul.f32 %v1095_v37, %v144_v56 }
  0xb7   :  { %v234_v24 = vadd.f32 %v209_v22, %v186_v12  ;;  %v291_v25 = vadd.f32 %v283_v13, %v209_v22  ;;  %v348_v26 = vadd.f32 %v340_v14, %v209_v22  ;;  %v405_v19 = vadd.f32 %v397_v15, %v209_v22 }
  0xb8   :  { %v431_v35 = vmax.f32 %v358_v17, %v415_v18  ;;  %v1208_v36 = vmax.f32 %v244_v20, %v301_v21  ;;  %v136_v13 = vadd.f32 %v128_v23, %v87_v62  ;;  %v265_v14 = vadd.f32 %v257_v16, %v249_v63 }
  0xb9   :  { %v356_v38 = vmax.f32 %v348_v26, 0.0  ;;  %v413_v39 = vmax.f32 %v405_v19, 0.0  ;;  %v242_v40 = vmax.f32 %v234_v24, 0.0  ;;  %v299_v44 = vmax.f32 %v291_v25, 0.0 }
  0xba   :  { %726 = vmatpush.msra.mxu1 %v431_v35  ;;  %759 = vmatpush.msra.mxu2 %v431_v35  ;;  %v272_v15 = vmul.f32 %v1091_v34, %v144_v56  ;;  %v322_v22 = vadd.f32 %v314_v48, %v306_v42  ;;  %v379_v24 = vadd.f32 %v371_v49, %v363_v1 }
  0xbb   :  { %472 = vrot.lane.b32.xlu2 %v1208_v36, %s966_s0  ;;  %677 = vmatpush.msra.mxu0 %v1208_v36  ;;  %v99_v41 = vpop.permute.xlu1 %98  ;;  %v429_v43 = vmax.f32 %v356_v38, %v413_v39  ;;  %v1213_v46 = vmax.f32 %v242_v40, %v299_v44  ;;  %v126_v25 = vmul.f32 %v1079_v27, %v1197_v51 }
  0xbc   :  { %727 = vmatpush.msra.mxu1 %v430_v30  ;;  %760 = vmatpush.msra.mxu2 %v430_v30  ;;  %v127_v52 = vmul.f32 %v1079_v27, %v99_v41  ;;  %v256_v54 = vmul.f32 %v1081_v28, %v99_v41  ;;  %v313_v33 = vmul.f32 %v1091_v34, %v99_v41 }
  0xbd   :  { %678 = vmatpush.msra.mxu0 %v1177_v32  ;;  %468 = vrot.lane.b32.xlu0 %v1213_v46, %s966_s0  ;;  %v370_v55 = vmul.f32 %v1095_v37, %v99_v41  ;;  %v255_v26 = vmul.f32 %v1081_v28, %v1197_v51  ;;  %v312_v44 = vmul.f32 %v1091_v34, %v1197_v51 }
  0xbe   :  { %728 = vmatpush.msra.mxu1 %v429_v43  ;;  %761 = vmatpush.msra.mxu2 %v429_v43  ;;  %v135_v3 = vadd.f32 %v127_v52, %v86_v50  ;;  %v264_v4 = vadd.f32 %v256_v54, %v248_v57  ;;  %v321_v30 = vadd.f32 %v313_v33, %v305_v58  ;;  %v199_v19 = vpop.permute.xlu2 %198 }
  0xbf   :  { %679 = vmatpush.msra.mxu0 %v1213_v46  ;;  %v378_v5 = vadd.f32 %v370_v55, %v362_v10  ;;  %v369_v41 = vmul.f32 %v1095_v37, %v1197_v51  ;;  %v185_v52 = vadd.f32 %v177_v59, %v136_v13  ;;  %v339_v54 = vadd.f32 %v331_v61, %v322_v22  ;;  %v606_v22 = vld [vmem:[%s1427_s4 + $0x20] sm:$0xff] }
  0xc0   :  { %v386_v57 = vmul.f32 %v1103_v45, %v144_v56 }
  0xc3   :  { %444 = vrot.lane.b32.xlu2 %v431_v35, %s967_s2 }
  0xc4   :  { %v47_v47 = vpop.permute.xlu1 %46 }
  0xc5   :  { %440 = vrot.lane.b32.xlu0 %v429_v43, %s967_s2  ;;  %v85_v35 = vmul.f32 %v1083_v29, %v47_v47  ;;  %v247_v38 = vmul.f32 %v1079_v27, %v47_v47  ;;  %v304_v43 = vmul.f32 %v1081_v28, %v47_v47  ;;  %v361_v23 = vmul.f32 %v1091_v34, %v47_v47 }
  0xc6   :  { %v282_v29 = vadd.f32 %v274_v60, %v265_v14  ;;  %v396_v27 = vadd.f32 %v388_v0, %v379_v24  ;;  %v1318_v24 = vld [vmem:[%s1426_s3 + $0x10] sm:$0xff] }
  0xc7   :  { %v134_v33 = vadd.f32 %v126_v25, %v85_v35  ;;  %v263_v55 = vadd.f32 %v255_v26, %v247_v38  ;;  %v320_v63 = vadd.f32 %v312_v44, %v304_v43  ;;  %v609_v25 = vld [vmem:[%s1427_s4 + $0x38] sm:$0xff]  ;;  %v1327_v26 = vld [vmem:[%s1426_s3 + $0x20] sm:$0xff]  ;;  %v1334_v38 = vld [vmem:[%s1426_s3 + $0x30] sm:$0xff] }
  0xc8   :  { %v1343_v43 = vld [vmem:[%s1426_s3 + $0x40] sm:$0xff] }
  0xc9   :  { %v337_v56 = vadd.f32 %v329_v31, %v320_v63 }
  0xcd   :  { %v148_v7 = vpop.permute.xlu1 %147 }
  0xce   :  { %v176_v8 = vmul.f32 %v1081_v28, %v148_v7  ;;  %v273_v11 = vmul.f32 %v1091_v34, %v148_v7  ;;  %v330_v12 = vmul.f32 %v1095_v37, %v148_v7  ;;  %v387_v6 = vmul.f32 %v1103_v45, %v148_v7 }
  0xcf   :  { %v377_v34 = vadd.f32 %v369_v41, %v361_v23  ;;  %v280_v45 = vadd.f32 %v272_v15, %v263_v55 }
  0xd0   :  { %v184_v17 = vadd.f32 %v176_v8, %v135_v3  ;;  %v281_v18 = vadd.f32 %v273_v11, %v264_v4  ;;  %v338_v20 = vadd.f32 %v330_v12, %v321_v30  ;;  %v395_v21 = vadd.f32 %v387_v6, %v378_v5 }
  0xd1   :  { %v183_v4 = vadd.f32 %v175_v2, %v134_v33  ;;  %v394_v30 = vadd.f32 %v386_v57, %v377_v34  ;;  %v552_v57 = vld [vmem:[%s1426_s3 + $0x70] sm:$0xff] }
  0xd2   :  { %v232_v39 = vadd.f32 %v199_v19, %v184_v17  ;;  %v289_v40 = vadd.f32 %v281_v18, %v199_v19  ;;  %v346_v16 = vadd.f32 %v338_v20, %v199_v19  ;;  %v403_v48 = vadd.f32 %v395_v21, %v199_v19  ;;  %v603_v18 = vld [vmem:[%s1427_s4 + $0x8] sm:$0xff]  ;;  %v605_v20 = vld [vmem:[%s1427_s4 + $0x18] sm:$0xff] }
  0xd4   :  { %v240_v49 = vmax.f32 %v232_v39, 0.0  ;;  %v297_v50 = vmax.f32 %v289_v40, 0.0  ;;  %v354_v47 = vmax.f32 %v346_v16, 0.0  ;;  %v411_v42 = vmax.f32 %v403_v48, 0.0  ;;  %v936_v39 = vld [vmem:[%s1428_s5] ss:$0 sm:$0xff] }
  0xd5   :  { %s970_s5 = smov 8  }
  0xd6   :  { %v204_v58 = vpop.permute.xlu1 %203  ;;  %v419_v10 = vmax.f32 %v240_v49, %v297_v50  ;;  %v427_v5 = vmax.f32 %v354_v47, %v411_v42  ;;  %v1350_v49 = vld [vmem:[%s1426_s3 + $0x50] sm:$0xff]  ;;  %v541_v42 = vld [vmem:[%s1426_s3 + $0x18] sm:$0xff] }
  0xd7   :  { %v233_v62 = vadd.f32 %v204_v58, %v185_v52  ;;  %v290_v37 = vadd.f32 %v282_v29, %v204_v58  ;;  %v347_v51 = vadd.f32 %v339_v54, %v204_v58  ;;  %v404_v28 = vadd.f32 %v396_v27, %v204_v58  ;;  %v1357_v27 = vld [vmem:[%s1426_s3 + $0x60] sm:$0xff] }
  0xd8   :  { %464 = vrot.lane.b32.xlu1 %v419_v10, %s966_s0 }
  0xd9   :  { %v355_v59 = vmax.f32 %v347_v51, 0.0  ;;  %v412_v60 = vmax.f32 %v404_v28, 0.0  ;;  %v241_v61 = vmax.f32 %v233_v62, 0.0  ;;  %v298_v0 = vmax.f32 %v290_v37, 0.0  ;;  %v539_v28 = vld [vmem:[%s1426_s3 + $0x8] sm:$0xff] }
  0xdb   :  { %v428_v1 = vmax.f32 %v355_v59, %v412_v60  ;;  %v420_v3 = vmax.f32 %v241_v61, %v298_v0  ;;  %v543_v59 = vld [vmem:[%s1426_s3 + $0x28] sm:$0xff]  ;;  %v602_v0 = vld [vmem:[%s1427_s4] sm:$0xff] }
  0xdd   :  { %729 = vmatpush.msra.mxu1 %v428_v1  ;;  %762 = vmatpush.msra.mxu2 %v428_v1 }
  0xde   :  { %466 = vrot.lane.b32.xlu2 %v420_v3, %s966_s0  ;;  %680 = vmatpush.msra.mxu0 %v420_v3  ;;  %v194_v7 = vpop.permute.xlu1 %193 }
  0xdf   :  { %v231_v8 = vadd.f32 %v194_v7, %v183_v4  ;;  %v288_v11 = vadd.f32 %v280_v45, %v194_v7  ;;  %v345_v12 = vadd.f32 %v337_v56, %v194_v7  ;;  %v402_v6 = vadd.f32 %v394_v30, %v194_v7  ;;  %730 = vmatpush.msra.mxu1 %v427_v5  ;;  %v547_v7 = vld [vmem:[%s1426_s3 + $0x48] sm:$0xff] }
  0xe0   :  { %681 = vmatpush.msra.mxu0 %v419_v10  ;;  %763 = vmatpush.msra.mxu2 %v427_v5 }
  0xe1   :  { %436 = vrot.lane.b32.xlu1 %v427_v5, %s967_s2  ;;  %v353_v2 = vmax.f32 %v345_v12, 0.0  ;;  %v410_v13 = vmax.f32 %v402_v6, 0.0  ;;  %v239_v14 = vmax.f32 %v231_v8, 0.0  ;;  %v296_v15 = vmax.f32 %v288_v11, 0.0  ;;  %v549_v8 = vld [vmem:[%s1426_s3 + $0x58] sm:$0xff]  ;;  %v551_v11 = vld [vmem:[%s1426_s3 + $0x68] sm:$0xff] }
  0xe2   :  { %v553_v12 = vld [vmem:[%s1426_s3 + $0x78] sm:$0xff]  ;;  %v607_v6 = vld [vmem:[%s1427_s4 + $0x28] sm:$0xff] }
  0xe3   :  { %v426_v31 = vmax.f32 %v353_v2, %v410_v13  ;;  %v418_v17 = vmax.f32 %v239_v14, %v296_v15 }
  0xe5   :  { %731 = vmatpush.msra.mxu1 %v426_v31  ;;  %764 = vmatpush.msra.mxu2 %v426_v31 }
  0xe6   :  { %438 = vrot.lane.b32.xlu2 %v428_v1, %s967_s2  ;;  %462 = vrot.lane.b32.xlu0 %v418_v17, %s966_s0  ;;  %v545_v1 = vld [vmem:[%s1426_s3 + $0x38] sm:$0xff] }
  0xe7   :  { %682 = vmatpush.msra.mxu0 %v418_v17  ;;  %765 = vmatpush.msra.mxu2 %v1138_v53  ;;  %v604_v53 = vld [vmem:[%s1427_s4 + $0x10] sm:$0xff] }
  0xe8   :  { %889 = vmatmul.msk.f32.vlgmr.msra.gmra.mxu1 %vm650_vm0, %v539_v28 }
  0xe9   :  { %617 = vperm.xlu1 %933, %v603_v18   ;;  %766 = vmatpush.msra.mxu2 %v1117_v9  ;;  %v1300_v9 = vld [vmem:[%s1426_s3] sm:$0xff]  ;;  %s968_s3 = smov [#allocation3]  }
  0xeb   :  { %767 = vmatpush.msra.mxu2 %v1208_v36  ;;  %v1309_v36 = vld [vmem:[%s1429_s6] ss:$0 sm:$0xff] }
  0xed   :  { %768 = vmatpush.msra.mxu2 %v1177_v32  ;;  %v608_v32 = vld [vmem:[%s1427_s4 + $0x30] sm:$0xff]  ;;  %s875_s4 = sshll.u32 %s968_s3, 4  ;;  %s876_s4 = int_to_ptr.vmem [resolvable:$true] %s875_s4 }
  0xee   :  { %434 = vrot.lane.b32.xlu2 %v426_v31, %s967_s2  ;;  %612 = vperm.xlu0 %934, %v602_v0   ;;  %s877_s2 = sshll.u32 %s1430_s7, 4  ;;  %s878_s2 = int_to_ptr.hbm [resolvable:$true] %s877_s2 }
  0xef   :  { %769 = vmatpush.msra.mxu2 %v1213_v46 }
  0xf0   :  { %890 = vmatmul.msk.f32.gmra.mxu1 %vm650_vm0, %v541_v42 }
  0xf1   :  { %627 = vperm.xlu1 %933, %v605_v20   ;;  %770 = vmatpush.msra.mxu2 %v420_v3 }
  0xf3   :  { %771 = vmatpush.msra.mxu2 %v419_v10 }
  0xf5   :  { %772 = vmatpush.msra.mxu2 %v418_v17 }
  0xf6   :  { %622 = vperm.xlu2 %932, %v604_v53   ;;  %773 = vmatmul.f32.vlgmr.msra.gmra.mxu2 %v1300_v9 }
  0xf7   :  { %637 = vperm.xlu0 %934, %v607_v6  }
  0xf8   :  { %891 = vmatmul.msk.f32.gmra.mxu1 %vm650_vm0, %v543_v59 }
  0xf9   :  { %642 = vperm.xlu1 %933, %v608_v32  }
  0xfa   :  { %v477_v46 = vpop.permute.xlu2 %476 }
  0xfb   :  { %v489_v21 = vmul.f32 %v1309_v36, %v477_v46 }
  0xfd   :  { %806 = vmatpush.msra.mxu3 %v489_v21 }
  0xfe   :  { %632 = vperm.xlu2 %932, %v606_v22   ;;  %776 = vmatmul.f32.gmra.mxu2 %v1318_v24 }
 0x100   :  { %892 = vmatmul.msk.f32.gmra.mxu1 %vm650_vm0, %v545_v1 }
 0x102   :  { %v475_v19 = vpop.permute.xlu0 %474 }
 0x103   :  { %v488_v35 = vmul.f32 %v1309_v36, %v475_v19 }
 0x105   :  { %807 = vmatpush.msra.mxu3 %v488_v35 }
 0x106   :  { %647 = vperm.xlu2 %932, %v609_v25   ;;  %779 = vmatmul.f32.gmra.mxu2 %v1327_v26 }
 0x108   :  { %893 = vmatmul.msk.f32.gmra.mxu1 %vm650_vm0, %v547_v7 }
 0x10a   :  { %v447_v40 = vpop.permute.xlu0 %446 }
 0x10b   :  { %v460_v23 = vmul.f32 %v936_v39, %v447_v40 }
 0x10e   :  { %782 = vmatmul.f32.gmra.mxu2 %v1334_v38 }
 0x110   :  { %894 = vmatmul.msk.f32.gmra.mxu1 %vm650_vm0, %v549_v8 }
 0x111   :  { %v449_v44 = vpop.permute.xlu1 %448 }
 0x112   :  { %v461_v41 = vmul.f32 %v936_v39, %v449_v44 }
 0x114   :  { %683 = vmatpush.msra.mxu0 %v461_v41 }
 0x115   :  { %v473_v16 = vpop.permute.xlu2 %472 }
 0x116   :  { %v487_v48 = vmul.f32 %v1309_v36, %v473_v16  ;;  %684 = vmatpush.msra.mxu0 %v460_v23  ;;  %785 = vmatmul.f32.gmra.mxu2 %v1343_v43 }
 0x118   :  { %808 = vmatpush.msra.mxu3 %v487_v48  ;;  %895 = vmatmul.msk.f32.gmra.mxu1 %vm650_vm0, %v551_v11 }
 0x11d   :  { %v445_v50 = vpop.permute.xlu2 %444 }
 0x11e   :  { %v459_v52 = vmul.f32 %v936_v39, %v445_v50  ;;  %v471_v29 = vpop.permute.xlu1 %470  ;;  %788 = vmatmul.f32.gmra.mxu2 %v1350_v49 }
 0x11f   :  { %v486_v54 = vmul.f32 %v1309_v36, %v471_v29 }
 0x120   :  { %685 = vmatpush.msra.mxu0 %v459_v52  ;;  %896 = vmatmul.msk.f32.gmra.mxu1 %vm650_vm0, %v553_v12 }
 0x121   :  { %809 = vmatpush.msra.mxu3 %v486_v54 }
 0x126   :  { %v443_v33 = vpop.permute.xlu1 %442  ;;  %791 = vmatmul.f32.gmra.mxu2 %v1357_v27 }
 0x127   :  { %v458_v55 = vmul.f32 %v936_v39, %v443_v33 }
 0x129   :  { %686 = vmatpush.msra.mxu0 %v458_v55 }
 0x12e   :  { %794 = vmatmul.f32.gmra.mxu2 %v552_v57 }
 0x12f   :  { %v469_v58 = vpop.permute.xlu0 %468 }
 0x130   :  { %v485_v10 = vmul.f32 %v1309_v36, %v469_v58 }
 0x132   :  { %810 = vmatpush.msra.mxu3 %v485_v10 }
 0x137   :  { %v441_v37 = vpop.permute.xlu0 %440 }
 0x138   :  { %v467_v62 = vpop.permute.xlu2 %466  ;;  %v457_v63 = vmul.f32 %v936_v39, %v441_v37 }
 0x139   :  { %v484_v51 = vmul.f32 %v1309_v36, %v467_v62 }
 0x13a   :  { %687 = vmatpush.msra.mxu0 %v457_v63 }
 0x13b   :  { %811 = vmatpush.msra.mxu3 %v484_v51 }
 0x140   :  { %v439_v34 = vpop.permute.xlu2 %438 }
 0x141   :  { %v456_v47 = vmul.f32 %v936_v39, %v439_v34 }
 0x143   :  { %688 = vmatpush.msra.mxu0 %v456_v47 }
 0x148   :  { %v435_v3 = vpop.permute.xlu2 %434 }
 0x149   :  { %v454_v56 = vmul.f32 %v936_v39, %v435_v3 }
 0x14a   :  { %v465_v60 = vpop.permute.xlu1 %464 }
 0x14b   :  { %v483_v61 = vmul.f32 %v1309_v36, %v465_v60 }
 0x14d   :  { %812 = vmatpush.msra.mxu3 %v483_v61 }
 0x150   :  { %v623_v41 = vpop.permute.xlu2 %622 }
 0x153   :  { %v437_v4 = vpop.permute.xlu1 %436 }
 0x154   :  { %v455_v45 = vmul.f32 %v936_v39, %v437_v4 }
 0x156   :  { %689 = vmatpush.msra.mxu0 %v455_v45 }
 0x158   :  { %v463_v30 = vpop.permute.xlu0 %462  ;;  %690 = vmatpush.msra.mxu0 %v454_v56 }
 0x159   :  { %v482_v5 = vmul.f32 %v1309_v36, %v463_v30  ;;  %691 = vmatmul.f32.vlgmr.msra.gmra.mxu0 %v1300_v9 }
 0x15b   :  { %813 = vmatpush.msra.mxu3 %v482_v5  ;;  %v618_v22 = vpop.permute.xlu1 %617 }
 0x15c   :  { %897 = vmatmul.msk.f32.vlgmr.msra.gmra.mxu3 %vm650_vm0, %v539_v28 }
 0x160   :  { %v613_v14 = vpop.permute.xlu0 %612 }
 0x161   :  { %694 = vmatmul.f32.gmra.mxu0 %v1318_v24 }
 0x163   :  { %v628_v55 = vpop.permute.xlu1 %627 }
 0x164   :  { %898 = vmatmul.msk.f32.gmra.mxu3 %vm650_vm0, %v541_v42 }
 0x165   :  { %v733_v13 = vpop.f32.mrf.mxu1 }
 0x169   :  { %697 = vmatmul.f32.gmra.mxu0 %v1327_v26  ;;  %v638_v3 = vpop.permute.xlu0 %637 }
 0x16c   :  { %899 = vmatmul.msk.f32.gmra.mxu3 %vm650_vm0, %v543_v59  ;;  %v633_v59 = vpop.permute.xlu2 %632 }
 0x16d   :  { %v736_v17 = vpop.f32.mrf.mxu1 }
 0x171   :  { %700 = vmatmul.f32.gmra.mxu0 %v1334_v38 }
 0x174   :  { %900 = vmatmul.msk.f32.gmra.mxu3 %vm650_vm0, %v545_v1 }
 0x175   :  { %v739_v24 = vpop.f32.mrf.mxu1 }
 0x179   :  { %703 = vmatmul.f32.gmra.mxu0 %v1343_v43  ;;  %v774_v2 = vpop.f32.mrf.mxu2 }
 0x17a   :  { %v775_v53 = vadd.f32 %v774_v2, %v613_v14 }
 0x17c   :  { %901 = vmatmul.msk.f32.gmra.mxu3 %vm650_vm0, %v547_v7 }
 0x181   :  { %706 = vmatmul.f32.gmra.mxu0 %v1350_v49  ;;  %v777_v15 = vpop.f32.mrf.mxu2  ;;  %v742_v49 = vpop.f32.mrf.mxu1 }
 0x182   :  { %v778_v35 = vadd.f32 %v777_v15, %v618_v22 }
 0x184   :  { %902 = vmatmul.msk.f32.gmra.mxu3 %vm650_vm0, %v549_v8 }
 0x189   :  { %709 = vmatmul.f32.gmra.mxu0 %v1357_v27  ;;  %v780_v36 = vpop.f32.mrf.mxu2  ;;  %v745_v51 = vpop.f32.mrf.mxu1 }
 0x18a   :  { %v781_v52 = vadd.f32 %v780_v36, %v623_v41 }
 0x18c   :  { %903 = vmatmul.msk.f32.gmra.mxu3 %vm650_vm0, %v551_v11 }
 0x191   :  { %712 = vmatmul.f32.gmra.mxu0 %v552_v57  ;;  %v783_v43 = vpop.f32.mrf.mxu2  ;;  %v748_v7 = vpop.f32.mrf.mxu1 }
 0x192   :  { %v784_v28 = vadd.f32 %v783_v43, %v628_v55 }
 0x194   :  { %904 = vmatmul.msk.f32.gmra.mxu3 %vm650_vm0, %v553_v12 }
 0x199   :  { %v786_v62 = vpop.f32.mrf.mxu2 }
 0x19a   :  { %v787_v4 = vadd.f32 %v786_v62, %v633_v59 }
 0x1a1   :  { %v789_v45 = vpop.f32.mrf.mxu2 }
 0x1d6   :  { %v692_v31 = vpop.f32.mrf.mxu0 }
 0x1d7   :  { %v693_v18 = vadd.f32 %v692_v31, %v613_v14  ;;  %v790_v14 = vadd.f32 %v789_v45, %v638_v3 }
 0x1d9   :  { %v734_v20 = vadd.f32 %v733_v13, %v693_v18 }
 0x1db   :  { %v839_v46 = vmax.f32 %v734_v20, 0.0 }
 0x1de   :  { %v695_v9 = vpop.f32.mrf.mxu0 }
 0x1df   :  { %v815_v32 = vpop.f32.mrf.mxu3  ;;  %v696_v25 = vadd.f32 %v695_v9, %v618_v22  ;;  %v751_v9 = vpop.f32.mrf.mxu1 }
 0x1e0   :  { %v816_v21 = vadd.f32 %v815_v32, %v775_v53  ;;  %v792_v53 = vpop.f32.mrf.mxu2 }
 0x1e1   :  { %v737_v38 = vadd.f32 %v736_v17, %v696_v25  ;;  %v643_v17 = vpop.permute.xlu1 %642 }
 0x1e2   :  { %v840_v26 = vmax.f32 %v816_v21, 0.0  ;;  %v793_v21 = vadd.f32 %v792_v53, %v643_v17 }
 0x1e3   :  { %v841_v23 = vmax.f32 %v737_v38, 0.0 }
 0x1e4   :  { %v855_v19 = vmax.f32 %v839_v46, %v840_v26 }
 0x1e6   :  { %863 = vst [vmem:[#allocation3] sm:$0xff] %v855_v19  ;;  %v698_v39 = vpop.f32.mrf.mxu0  ;;  %v648_v19 = vpop.permute.xlu2 %647 }
 0x1e7   :  { %v818_v40 = vpop.f32.mrf.mxu3  ;;  %v699_v16 = vadd.f32 %v698_v39, %v623_v41 }
 0x1e8   :  { %v819_v44 = vadd.f32 %v818_v40, %v778_v35  ;;  %v795_v40 = vpop.f32.mrf.mxu2 }
 0x1e9   :  { %v740_v29 = vadd.f32 %v739_v24, %v699_v16  ;;  %v796_v43 = vadd.f32 %v795_v40, %v648_v19 }
 0x1ea   :  { %v842_v48 = vmax.f32 %v819_v44, 0.0  ;;  %v754_v44 = vpop.f32.mrf.mxu1 }
 0x1eb   :  { %v843_v57 = vmax.f32 %v740_v29, 0.0 }
 0x1ec   :  { %v856_v50 = vmax.f32 %v841_v23, %v842_v48 }
 0x1ee   :  { %864 = vst [vmem:[#allocation3 + $0x8] sm:$0xff] %v856_v50  ;;  %v701_v54 = vpop.f32.mrf.mxu0 }
 0x1ef   :  { %v821_v27 = vpop.f32.mrf.mxu3  ;;  %v702_v58 = vadd.f32 %v701_v54, %v628_v55 }
 0x1f0   :  { %v822_v33 = vadd.f32 %v821_v27, %v781_v52 }
 0x1f1   :  { %v743_v63 = vadd.f32 %v742_v49, %v702_v58 }
 0x1f2   :  { %v844_v10 = vmax.f32 %v822_v33, 0.0 }
 0x1f3   :  { %v845_v60 = vmax.f32 %v743_v63, 0.0 }
 0x1f4   :  { %v857_v37 = vmax.f32 %v843_v57, %v844_v10 }
 0x1f6   :  { %865 = vst [vmem:[#allocation3 + $0x10] sm:$0xff] %v857_v37  ;;  %v704_v34 = vpop.f32.mrf.mxu0 }
 0x1f7   :  { %v824_v47 = vpop.f32.mrf.mxu3  ;;  %v705_v61 = vadd.f32 %v704_v34, %v633_v59 }
 0x1f8   :  { %v825_v42 = vadd.f32 %v824_v47, %v784_v28 }
 0x1f9   :  { %v746_v56 = vadd.f32 %v745_v51, %v705_v61 }
 0x1fa   :  { %v846_v0 = vmax.f32 %v825_v42, 0.0 }
 0x1fb   :  { %v847_v12 = vmax.f32 %v746_v56, 0.0 }
 0x1fc   :  { %v858_v1 = vmax.f32 %v845_v60, %v846_v0 }
 0x1fe   :  { %866 = vst [vmem:[#allocation3 + $0x18] sm:$0xff] %v858_v1  ;;  %v707_v30 = vpop.f32.mrf.mxu0 }
 0x1ff   :  { %v827_v5 = vpop.f32.mrf.mxu3  ;;  %v708_v11 = vadd.f32 %v707_v30, %v638_v3 }
 0x200   :  { %v828_v8 = vadd.f32 %v827_v5, %v787_v4 }
 0x201   :  { %v749_v13 = vadd.f32 %v748_v7, %v708_v11 }
 0x202   :  { %v848_v6 = vmax.f32 %v828_v8, 0.0 }
 0x203   :  { %v849_v18 = vmax.f32 %v749_v13, 0.0 }
 0x204   :  { %v859_v2 = vmax.f32 %v847_v12, %v848_v6 }
 0x206   :  { %867 = vst [vmem:[#allocation3 + $0x20] sm:$0xff] %v859_v2  ;;  %v710_v15 = vpop.f32.mrf.mxu0 }
 0x207   :  { %v830_v31 = vpop.f32.mrf.mxu3  ;;  %v711_v32 = vadd.f32 %v710_v15, %v643_v17 }
 0x208   :  { %v831_v20 = vadd.f32 %v830_v31, %v790_v14 }
 0x209   :  { %v752_v22 = vadd.f32 %v751_v9, %v711_v32 }
 0x20a   :  { %v850_v36 = vmax.f32 %v831_v20, 0.0 }
 0x20b   :  { %v851_v35 = vmax.f32 %v752_v22, 0.0 }
 0x20c   :  { %v860_v46 = vmax.f32 %v849_v18, %v850_v36 }
 0x20e   :  { %868 = vst [vmem:[#allocation3 + $0x28] sm:$0xff] %v860_v46  ;;  %v713_v24 = vpop.f32.mrf.mxu0 }
 0x20f   :  { %v833_v25 = vpop.f32.mrf.mxu3  ;;  %v714_v38 = vadd.f32 %v713_v24, %v648_v19 }
 0x210   :  { %v834_v26 = vadd.f32 %v833_v25, %v793_v21 }
 0x211   :  { %v755_v23 = vadd.f32 %v754_v44, %v714_v38 }
 0x212   :  { %v852_v39 = vmax.f32 %v834_v26, 0.0 }
 0x213   :  { %v853_v49 = vmax.f32 %v755_v23, 0.0 }
 0x214   :  { %v861_v41 = vmax.f32 %v851_v35, %v852_v39 }
 0x216   :  { %869 = vst [vmem:[#allocation3 + $0x30] sm:$0xff] %v861_v41 }
 0x217   :  { %v836_v16 = vpop.f32.mrf.mxu3 }
 0x218   :  { %v837_v48 = vadd.f32 %v836_v16, %v796_v43 }
 0x21a   :  { %v854_v50 = vmax.f32 %v837_v48, 0.0 }
 0x21c   :  { %v862_v52 = vmax.f32 %v853_v49, %v854_v50 }
 0x21e   :  { %870 = vst [vmem:[#allocation3 + $0x38] sm:$0xff] %v862_v52 }
 0x21f   :  { %883 = dma.vmem_to_hbm [thread:$0]  %s876_s4, 1024, %s878_s2, [#allocation4], %s969_s11, %s969_s11, %s970_s5  }
 0x220   :  { %961 = dma.done.wait [#allocation4], 1024  }
 0x221   :  { %962 = vsyncadd [#allocation4], 4294966272 }
 0x222   :  { %888 = vsyncpa [#allocation4], 1 }

</bundles_post_ra>
